<compile_context>
chip_gen: v7x
topology: tpu7x:2x2x1
jax: 0.10.0
libtpu: 0.0.40
codegen_flags: <defaults>
</compile_context>

<pallas_src>
import jax
import jax.numpy as jnp
from jax.experimental import pallas as pl
from jax.experimental.pallas import tpu as pltpu


def _round_up(v: int, m: int) -> int:
    return (v + m - 1) // m * m


def _cdiv(a: int, b: int) -> int:
    return -(-a // b)


# --------------------------------------------------------------------------
# Kernel: one (TB, Np) batch tile, accumulating over hidden-dim tiles.
# --------------------------------------------------------------------------
def _linear_skip_kernel(x_ref, w1t_ref, b1_ref, w2t_ref, b2_ref, o_ref, acc_ref):
    h = pl.program_id(1)

    @pl.when(h == 0)
    def _():
        acc_ref[...] = jnp.zeros_like(acc_ref)

    x = x_ref[...]                        # (TB, Np), resident across the h axis
    xm = x.astype(w1t_ref.dtype)          # matmul operand dtype (f32 or bf16)

    # Linear1 for this hidden tile: (TB, Np) @ (Np, TH) -> (TB, TH), f32 acc.
    hid = jnp.dot(xm, w1t_ref[...], preferred_element_type=jnp.float32)
    hid = jnp.maximum(hid + b1_ref[...], 0.0)

    # Linear2 partial product: (TB, TH) @ (TH, Np) -> (TB, Np), accumulated.
    acc_ref[...] += jnp.dot(hid.astype(w2t_ref.dtype), w2t_ref[...],
                            preferred_element_type=jnp.float32)

    @pl.when(h == pl.num_programs(1) - 1)
    def _():
        y = acc_ref[...] + b2_ref[...]
        o_ref[...] = jnp.maximum(x.astype(jnp.float32) + y, 0.0).astype(o_ref.dtype)


# --------------------------------------------------------------------------
# Sizing heuristics.
# --------------------------------------------------------------------------
def _physical_vmem_cap_bytes() -> int:
    # Capability probe only (never used to mask kernel compile errors).
    try:
        phys = int(pltpu.get_tpu_info().vmem_capacity_bytes)
    except Exception:
        phys = 64 * 1024 * 1024            # v7x-sized assumption: safe everywhere
    return int(phys * 0.85)


def _pick_batch_tile(B: int, max_tile: int = 512) -> int:
    """Balanced batch tile: avoids Bp = round_up(B, TB) nearly doubling work."""
    B8 = _round_up(B, 8)
    if B8 <= max_tile:
        return B8
    n_tiles = _cdiv(B8, max_tile)
    tb = _round_up(_cdiv(B8, n_tiles), 8)          # balanced across tiles
    tb_mxu = _round_up(tb, 256)                    # full MXU M if it costs no extra pad
    if _round_up(B8, tb_mxu) <= _round_up(B8, tb):
        tb = tb_mxu
    return tb


def _pick_hidden_tile(np_: int, tb: int, x_item: int, w_item: int, cap: int) -> int:
    """Largest hidden tile (multiple of 128) whose weight blocks fit in VMEM."""
    fixed = (2 * 2 * tb * np_ * x_item     # x & o tiles, double-buffered
             + tb * np_ * 4                # f32 accumulator scratch
             + tb * np_ * 4)               # f32 pre-ReLU / skip temporaries
    # Per hidden column: one w1^T column + one w2^T row (double-buffered) plus
    # one f32 hidden-activation column.
    per_col = 2 * 2 * np_ * w_item + tb * 4
    avail = cap - fixed
    if avail >= int(per_col * np_ * 1.3):          # full weights fit with headroom
        return np_
    th = (int(avail / 1.3) // per_col) // 128 * 128
    return max(128, min(np_, th))


def _vmem_limit_bytes(tb: int, np_: int, th: int, x_item: int, w_item: int,
                      cap: int) -> int:
    io = 2 * 2 * tb * np_ * x_item                 # x & o tiles, double-buffered
    wts = 2 * 2 * np_ * th * w_item                # w1^T & w2^T blocks, double-buffered
    wts += 4 * (th + np_) * 4                      # b1 / b2 (f32)
    scratch = tb * np_ * 4                         # accumulator
    internal = tb * th * 4 + tb * np_ * 4          # hidden activation + pre-ReLU y
    est = int(1.5 * (io + wts + scratch + internal))
    return min(max(est, 32 * 1024 * 1024), cap)


# --------------------------------------------------------------------------
# Wrapper.
# --------------------------------------------------------------------------
def linear_skip_block(x, w1, b1, w2, b2, *, batch_tile=512, compute_dtype=None):
    """x: (B, N). w1, w2: (N, N) in PyTorch (out, in) layout. b1, b2: (N,)."""
    B, N = x.shape
    Np = _round_up(N, 128)                         # lane-dense feature dim
    TB = _pick_batch_tile(B, batch_tile)
    Bp = _round_up(B, TB)

    x_item = jnp.dtype(x.dtype).itemsize
    w_dtype = jnp.dtype(compute_dtype) if compute_dtype is not None else jnp.dtype(w1.dtype)
    w_item = w_dtype.itemsize

    cap = _physical_vmem_cap_bytes()
    TH = _pick_hidden_tile(Np, TB, x_item, w_item, cap)
    Hp = _round_up(Np, TH)                         # hidden dim padded to tile multiple
    vmem_bytes = _vmem_limit_bytes(TB, Np, TH, x_item, w_item, cap)

    def pad2(a, rows, cols):
        pr, pc = rows - a.shape[0], cols - a.shape[1]
        return a if (pr == 0 and pc == 0) else jnp.pad(a, ((0, pr), (0, pc)))

    # Transpose weights ONCE here so the kernel contracts on the canonical axis
    # (no per-grid-step XLU transpose inside the kernel).  Zero padding is exact
    # through both linears, the skip add and the ReLUs.
    w1t = w1.T.astype(w_dtype)                     # (in, hidden)
    w2t = w2.T.astype(w_dtype)                     # (hidden, out)

    x_p = pad2(x, Bp, Np)
    w1t_p = pad2(w1t, Np, Hp)
    w2t_p = pad2(w2t, Hp, Np)
    b1_p = pad2(b1.astype(jnp.float32).reshape(1, N), 1, Hp)
    b2_p = pad2(b2.astype(jnp.float32).reshape(1, N), 1, Np)

    n_bt = Bp // TB
    n_ht = Hp // TH

    # Only shard the batch axis across cores when there is enough work per core
    # to amortise each core's private weight DMA (v7x megacore).
    batch_sem = "parallel" if n_bt >= 4 else "arbitrary"

    cost = pl.CostEstimate(
        flops=2 * 2 * Bp * Np * Hp,                # two (Bp,Np)x(Np,Hp)-class matmuls
        transcendentals=0,
        bytes_accessed=(2 * Bp * Np * x_item       # x in + out
                        + (w1t_p.size + w2t_p.size) * w_item
                        + (b1_p.size + b2_p.size) * 4),
    )

    out_p = pl.pallas_call(
        _linear_skip_kernel,
        out_shape=jax.ShapeDtypeStruct((Bp, Np), x.dtype),
        grid=(n_bt, n_ht),
        in_specs=[
            pl.BlockSpec((TB, Np), lambda i, h: (i, 0)),   # x: batch-tiled, resident over h
            pl.BlockSpec((Np, TH), lambda i, h: (0, h)),   # w1^T column block
            pl.BlockSpec((1, TH), lambda i, h: (0, h)),    # b1 block
            pl.BlockSpec((TH, Np), lambda i, h: (h, 0)),   # w2^T row block
            pl.BlockSpec((1, Np), lambda i, h: (0, 0)),    # b2 (grid-invariant)
        ],
        out_specs=pl.BlockSpec((TB, Np), lambda i, h: (i, 0)),
        scratch_shapes=[pltpu.VMEM((TB, Np), jnp.float32)],   # f32 accumulator
        compiler_params=pltpu.CompilerParams(
            dimension_semantics=(batch_sem, "arbitrary"),
            vmem_limit_bytes=vmem_bytes,
        ),
        cost_estimate=cost,
    )(x_p, w1t_p, b1_p, w2t_p, b2_p)

    return out_p[:B, :N]


if __name__ == "__main__":
    key = jax.random.PRNGKey(0)
    B, N = 8, 32  # batch, num_neurons

    kx, kw1, kb1, kw2, kb2 = jax.random.split(key, 5)
    x = jax.random.normal(kx, (B, N), dtype=jnp.float32)
    # Deterministic init mimicking torch.nn.Linear uniform(-1/sqrt(N), 1/sqrt(N))
    bound = 1.0 / jnp.sqrt(N)
    w1 = jax.random.uniform(kw1, (N, N), jnp.float32, -bound, bound)
    b1 = jax.random.uniform(kb1, (N,), jnp.float32, -bound, bound)
    w2 = jax.random.uniform(kw2, (N, N), jnp.float32, -bound, bound)
    b2 = jax.random.uniform(kb2, (N,), jnp.float32, -bound, bound)

    out = linear_skip_block(x, w1, b1, w2, b2)
    out = jax.block_until_ready(out)

    # Pure-JAX reference (PyTorch Linear: x @ W.T + b).
    h_ref = jnp.maximum(x @ w1.T + b1, 0.0)
    ref = jnp.maximum(x + (h_ref @ w2.T + b2), 0.0)
    assert out.shape == ref.shape
    assert jnp.allclose(out, ref, atol=1e-5, rtol=1e-5), "mismatch vs reference"

    print("KERNEL_OK")
</pallas_src>

<mosaic_0001>
module attributes {stable_mosaic.version = 11 : i64} {
  func.func @_linear_skip_kernel(%arg0: i32, %arg1: i32, %arg2: memref<8x128xf32, #tpu.memory_space<vmem>>, %arg3: memref<128x128xf32, #tpu.memory_space<vmem>>, %arg4: memref<1x128xf32, #tpu.memory_space<vmem>>, %arg5: memref<128x128xf32, #tpu.memory_space<vmem>>, %arg6: memref<1x128xf32, #tpu.memory_space<vmem>>, %arg7: memref<8x128xf32, #tpu.memory_space<vmem>>, %arg8: memref<8x128xf32, #tpu.memory_space<vmem>>) attributes {dimension_semantics = [#tpu.dimension_semantics<arbitrary>, #tpu.dimension_semantics<arbitrary>], iteration_bounds = array<i64: 1, 1>, scalar_prefetch = 0 : i64, scratch_operands = 1 : i64, tpu.core_type = #tpu.core_type<tc>, window_params = [{transform_indices = @transform_0, window_bounds = array<i64: 8, 128>}, {transform_indices = @transform_1, window_bounds = array<i64: 128, 128>}, {transform_indices = @transform_2, window_bounds = array<i64: 1, 128>}, {transform_indices = @transform_3, window_bounds = array<i64: 128, 128>}, {pipeline_mode = #tpu.pipeline_mode<synchronous>, transform_indices = @transform_4, window_bounds = array<i64: 1, 128>}, {transform_indices = @transform_5, window_bounds = array<i64: 8, 128>}]} {
    %c0_i32 = arith.constant 0 : i32
    %0 = arith.cmpi eq, %arg1, %c0_i32 : i32
    %1 = arith.extui %0 : i1 to i32
    %c0_i32_0 = arith.constant 0 : i32
    %2 = arith.cmpi ne, %1, %c0_i32_0 : i32
    scf.if %2 {
      %cst_16 = arith.constant 0.000000e+00 : f32
      %19 = vector.broadcast %cst_16 : f32 to vector<8x128xf32>
      %c0_17 = arith.constant 0 : index
      %c0_18 = arith.constant 0 : index
      %20 = vector.load %arg8[%c0_17, %c0_18] : memref<8x128xf32, #tpu.memory_space<vmem>>, vector<8x128xf32>
      tpu.vector_store %arg8[%c0_17, %c0_18], %19 {strides = array<i32>} : memref<8x128xf32, #tpu.memory_space<vmem>>, vector<8x128xf32>,
    } else {
    }
    %c0 = arith.constant 0 : index
    %c0_1 = arith.constant 0 : index
    %3 = vector.load %arg2[%c0, %c0_1] : memref<8x128xf32, #tpu.memory_space<vmem>>, vector<8x128xf32>
    %c0_2 = arith.constant 0 : index
    %c0_3 = arith.constant 0 : index
    %4 = vector.load %arg3[%c0_2, %c0_3] : memref<128x128xf32, #tpu.memory_space<vmem>>, vector<128x128xf32>
    %cst = arith.constant dense<0.000000e+00> : vector<8x128xf32>
    %5 = tpu.matmul %3, %4, %cst {dimension_numbers = #tpu.dot_dimension_numbers<[1], [0], [0], [1], [0, 0, 1, 1], [], []>} : vector<8x128xf32>, vector<128x128xf32>, vector<8x128xf32> -> vector<8x128xf32>
    %c0_4 = arith.constant 0 : index
    %c0_5 = arith.constant 0 : index
    %6 = vector.load %arg4[%c0_4, %c0_5] : memref<1x128xf32, #tpu.memory_space<vmem>>, vector<1x128xf32>
    %7 = vector.broadcast %6 : vector<1x128xf32> to vector<8x128xf32>
    %8 = arith.addf %5, %7 : vector<8x128xf32>
    %cst_6 = arith.constant 0.000000e+00 : f32
    %9 = vector.broadcast %cst_6 : f32 to vector<8x128xf32>
    %10 = arith.maximumf %8, %9 : vector<8x128xf32>
    %c0_7 = arith.constant 0 : index
    %c0_8 = arith.constant 0 : index
    %11 = vector.load %arg8[%c0_7, %c0_8] : memref<8x128xf32, #tpu.memory_space<vmem>>, vector<8x128xf32>
    %c0_9 = arith.constant 0 : index
    %c0_10 = arith.constant 0 : index
    %12 = vector.load %arg5[%c0_9, %c0_10] : memref<128x128xf32, #tpu.memory_space<vmem>>, vector<128x128xf32>
    %cst_11 = arith.constant dense<0.000000e+00> : vector<8x128xf32>
    %13 = tpu.matmul %10, %12, %cst_11 {dimension_numbers = #tpu.dot_dimension_numbers<[1], [0], [0], [1], [0, 0, 1, 1], [], []>} : vector<8x128xf32>, vector<128x128xf32>, vector<8x128xf32> -> vector<8x128xf32>
    %14 = arith.addf %11, %13 : vector<8x128xf32>
    %c0_12 = arith.constant 0 : index
    %c0_13 = arith.constant 0 : index
    %15 = vector.load %arg8[%c0_12, %c0_13] : memref<8x128xf32, #tpu.memory_space<vmem>>, vector<8x128xf32>
    tpu.vector_store %arg8[%c0_12, %c0_13], %14 {strides = array<i32>} : memref<8x128xf32, #tpu.memory_space<vmem>>, vector<8x128xf32>,
    %c0_i32_14 = arith.constant 0 : i32
    %16 = arith.cmpi eq, %arg1, %c0_i32_14 : i32
    %17 = arith.extui %16 : i1 to i32
    %c0_i32_15 = arith.constant 0 : i32
    %18 = arith.cmpi ne, %17, %c0_i32_15 : i32
    scf.if %18 {
      %c0_16 = arith.constant 0 : index
      %c0_17 = arith.constant 0 : index
      %19 = vector.load %arg8[%c0_16, %c0_17] : memref<8x128xf32, #tpu.memory_space<vmem>>, vector<8x128xf32>
      %c0_18 = arith.constant 0 : index
      %c0_19 = arith.constant 0 : index
      %20 = vector.load %arg6[%c0_18, %c0_19] : memref<1x128xf32, #tpu.memory_space<vmem>>, vector<1x128xf32>
      %21 = vector.broadcast %20 : vector<1x128xf32> to vector<8x128xf32>
      %22 = arith.addf %19, %21 : vector<8x128xf32>
      %23 = arith.addf %3, %22 : vector<8x128xf32>
      %cst_20 = arith.constant 0.000000e+00 : f32
      %24 = vector.broadcast %cst_20 : f32 to vector<8x128xf32>
      %25 = arith.maximumf %23, %24 : vector<8x128xf32>
      %c0_21 = arith.constant 0 : index
      %c0_22 = arith.constant 0 : index
      %26 = vector.load %arg7[%c0_21, %c0_22] : memref<8x128xf32, #tpu.memory_space<vmem>>, vector<8x128xf32>
      tpu.vector_store %arg7[%c0_21, %c0_22], %25 {strides = array<i32>} : memref<8x128xf32, #tpu.memory_space<vmem>>, vector<8x128xf32>,
    } else {
    }
    return
  }
  func.func @transform_0(%arg0: i32, %arg1: i32) -> (i32, i32) {
    %c0_i32 = arith.constant 0 : i32
    %c0_i32_0 = arith.constant 0 : i32
    return %arg0, %c0_i32 : i32, i32
  }
  func.func @transform_1(%arg0: i32, %arg1: i32) -> (i32, i32) {
    %c0_i32 = arith.constant 0 : i32
    %c0_i32_0 = arith.constant 0 : i32
    return %c0_i32, %arg1 : i32, i32
  }
  func.func @transform_2(%arg0: i32, %arg1: i32) -> (i32, i32) {
    %c0_i32 = arith.constant 0 : i32
    %c0_i32_0 = arith.constant 0 : i32
    return %c0_i32, %arg1 : i32, i32
  }
  func.func @transform_3(%arg0: i32, %arg1: i32) -> (i32, i32) {
    %c0_i32 = arith.constant 0 : i32
    %c0_i32_0 = arith.constant 0 : i32
    return %arg1, %c0_i32 : i32, i32
  }
  func.func @transform_4(%arg0: i32, %arg1: i32) -> (i32, i32) {
    %c0_i32 = arith.constant 0 : i32
    %c0_i32_0 = arith.constant 0 : i32
    %c0_i32_1 = arith.constant 0 : i32
    return %c0_i32, %c0_i32_0 : i32, i32
  }
  func.func @transform_5(%arg0: i32, %arg1: i32) -> (i32, i32) {
    %c0_i32 = arith.constant 0 : i32
    %c0_i32_0 = arith.constant 0 : i32
    return %arg0, %c0_i32 : i32, i32
  }
}

</mosaic_0001>

<bundles_post_ra>
// kernel: tpu_custom_call.1
= control target key start
LH: loop header
LB: loop body
LE: loop exit
PB: predicated region body
PF: predicated region fallthrough
CT: control target
= control target key end

     0   :  { %10 = vsyncpa [#allocation4], 0  ;;  %s652_s0 = inlined_call_operand.hbm [shape: f32[8,128], index: 0, kind: input, shape index: {}]   ;;  %s653_s1 = inlined_call_operand.hbm [shape: f32[128,128], index: 1, kind: input, shape index: {}]   ;;  %s654_s2 = inlined_call_operand.vmem [shape: f32[1,128], index: 2, kind: input, shape index: {}]   ;;  %s655_s3 = inlined_call_operand.hbm [shape: f32[128,128], index: 3, kind: input, shape index: {}]   ;;  %s656_s4 = inlined_call_operand.vmem [shape: f32[1,128], index: 4, kind: input, shape index: {}]   ;;  %s657_s5 = inlined_call_operand.hbm [shape: f32[8,128], index: 5, kind: output, shape index: {}]  }
   0x1   :  { %11 = vsyncpa [#allocation7], 0 }
   0x2   :  { %12 = vsyncpa [#allocation5], 0  ;;  %s537_s18 = smov [#allocation6]   ;;  %s443_s22 = scalar_lea.hbm %s653_s1, 2048 }
   0x3   :  { %s28_s19 = sshll.u32 %s537_s18, 4  ;;  %p444_p0 = scmp.ne.s32.totalorder %s653_s1, %s443_s22  ;;  %s29_s19 = int_to_ptr.vmem [resolvable:$true] %s28_s19 }
   0x4   :  { %p447_p1 = scmp.lt.u32.totalorder %s443_s22, %s653_s1 }
   0x6   :  { %p449_p2 = pnand %p447_p1, %p444_p0 }
   0x8   :  { %452 = shalt.err (!%p449_p2)
}
   0x9   :  { %s453_s27 = scalar_lea.vmem %s29_s19, 2048  ;;  %p458_p4 = scmp.lt.s32.totalorder %s29_s19, %s29_s19 }
   0xa   :  { %p454_p3 = scmp.ne.s32.totalorder %s29_s19, %s453_s27  ;;  %p459_p5 = scmp.lt.s32.totalorder %s453_s27, %s453_s27 }
   0xc   :  { %p460_p6 = por %p459_p5, %p458_p4 }
   0xe   :  { %p461_p7 = pnand %p460_p6, %p454_p3 }
  0x10   :  { %464 = shalt.err (!%p461_p7)
}
  0x11   :  { %s538_s28 = smov 128   ;;  %s539_s29 = smov 8  }
  0x12   :  { %34 = dma.hbm_to_vmem [thread:$0]  %s653_s1, 2048, %s29_s19, [#allocation7], %s538_s28, %s538_s28, %s539_s29  }
  0x13   :  { %s540_s7 = smov [#allocation3]   ;;  %s541_s9 = smov [#allocation8]  }
  0x14   :  { %s19_s8 = sshll.u32 %s540_s7, 4  ;;  %s42_s10 = sshll.u32 %s541_s9, 4  ;;  %s20_s8 = int_to_ptr.vmem [resolvable:$true] %s19_s8  ;;  %s43_s10 = int_to_ptr.vmem [resolvable:$true] %s42_s10 }
  0x15   :  { %s465_s13 = scalar_lea.hbm %s652_s0, 128 }
  0x16   :  { %p466_p8 = scmp.ne.s32.totalorder %s652_s0, %s465_s13  ;;  %p469_p9 = scmp.lt.u32.totalorder %s465_s13, %s652_s0 }
  0x18   :  { %p471_p10 = pnand %p469_p9, %p466_p8 }
  0x1a   :  { %474 = shalt.err (!%p471_p10)
}
  0x1b   :  { %s475_s1 = scalar_lea.vmem %s20_s8, 128  ;;  %p480_p12 = scmp.lt.s32.totalorder %s20_s8, %s20_s8 }
  0x1c   :  { %p476_p11 = scmp.ne.s32.totalorder %s20_s8, %s475_s1  ;;  %p481_p13 = scmp.lt.s32.totalorder %s475_s1, %s475_s1 }
  0x1e   :  { %p482_p0 = por %p481_p13, %p480_p12 }
  0x20   :  { %p483_p1 = pnand %p482_p0, %p476_p11 }
  0x22   :  { %486 = shalt.err (!%p483_p1)
}
  0x23   :  { %22 = dma.hbm_to_vmem [thread:$0]  %s652_s0, 128, %s20_s8, [#allocation4]  }
  0x24   :  { %s487_s22 = scalar_lea.hbm %s655_s3, 2048 }
  0x25   :  { %p488_p2 = scmp.ne.s32.totalorder %s655_s3, %s487_s22  ;;  %p491_p3 = scmp.lt.u32.totalorder %s487_s22, %s655_s3 }
  0x27   :  { %p493_p4 = pnand %p491_p3, %p488_p2 }
  0x29   :  { %496 = shalt.err (!%p493_p4)
}
  0x2a   :  { %s497_s27 = scalar_lea.vmem %s43_s10, 2048  ;;  %p502_p6 = scmp.lt.s32.totalorder %s43_s10, %s43_s10 }
  0x2b   :  { %p498_p5 = scmp.ne.s32.totalorder %s43_s10, %s497_s27  ;;  %p503_p7 = scmp.lt.s32.totalorder %s497_s27, %s497_s27 }
  0x2d   :  { %p504_p8 = por %p503_p7, %p502_p6 }
  0x2f   :  { %p505_p9 = pnand %p504_p8, %p498_p5 }
  0x31   :  { %508 = shalt.err (!%p505_p9)
}
  0x32   :  { %48 = dma.hbm_to_vmem [thread:$0]  %s655_s3, 2048, %s43_s10, [#allocation7], %s538_s28, %s538_s28, %s539_s29  }
  0x33   :  { %531 = dma.done.wait [#allocation4], 128  }
  0x34   :  { %532 = vsyncadd [#allocation4], 4294967168 }
  0x35   :  { %533 = dma.done.wait [#allocation7], 4096  }
  0x36   :  { %534 = vsyncadd [#allocation7], 4294963200  ;;  %v542_v0 = vmov 0.0|0.0   ;;  %vm543_vm0 = vmmov 0   ;;  %v544_v1 = vmov 0.0   ;;  %v66_v2 = vld [vmem:[#allocation6] sm:$0xff] }
  0x37   :  { %386 = vmatprep.subr.bf16.mxu0 %v542_v0  ;;  %348 = vmatprep.mubr.msk.f32.mxu0 %vm543_vm0, %v544_v1  ;;  %v67_v3 = vld [vmem:[#allocation6 + $0x8] sm:$0xff]  ;;  %v68_v4 = vld [vmem:[#allocation6 + $0x10] sm:$0xff]  ;;  %v69_v6 = vld [vmem:[#allocation6 + $0x18] sm:$0xff]  ;;  %s545_s7 = smov [#allocation9]  }
  0x38   :  { %410 = vmatprep.subr.bf16.mxu1 %v542_v0  ;;  %383 = vmatprep.mubr.msk.f32.mxu1 %vm543_vm0, %v544_v1  ;;  %v387_v5 = vpack.c.bf16 %v67_v3, %v66_v2  ;;  %v390_v7 = vpack.c.bf16 %v69_v6, %v68_v4  ;;  %v70_v8 = vld [vmem:[#allocation6 + $0x20] sm:$0xff]  ;;  %v71_v9 = vld [vmem:[#allocation6 + $0x28] sm:$0xff]  ;;  %v163_v12 = vld [vmem:[#allocation8 + $0x10] sm:$0xff]  ;;  %s270_s8 = sshll.u32 %s545_s7, 4  ;;  %s271_s8 = int_to_ptr.vmem [resolvable:$true] %s270_s8 }
  0x39   :  { %v161_v10 = vld [vmem:[#allocation8] sm:$0xff]  ;;  %v162_v11 = vld [vmem:[#allocation8 + $0x8] sm:$0xff]  ;;  %v164_v13 = vld [vmem:[#allocation8 + $0x18] sm:$0xff]  ;;  %v393_v14 = vpack.c.bf16 %v71_v9, %v70_v8  ;;  %s509_s9 = scalar_lea.vmem %s271_s8, 128  ;;  %p514_p11 = scmp.lt.s32.totalorder %s271_s8, %s271_s8 }
  0x3a   :  { %388 = vmatpush3.bf16.msra.mxu0 %v387_v5  ;;  %v411_v15 = vpack.c.bf16 %v162_v11, %v161_v10  ;;  %v72_v16 = vld [vmem:[#allocation6 + $0x30] sm:$0xff]  ;;  %v73_v17 = vld [vmem:[#allocation6 + $0x38] sm:$0xff]  ;;  %v414_v18 = vpack.c.bf16 %v164_v13, %v163_v12  ;;  %v165_v19 = vld [vmem:[#allocation8 + $0x20] sm:$0xff]  ;;  %p510_p10 = scmp.ne.s32.totalorder %s271_s8, %s509_s9  ;;  %p515_p12 = scmp.lt.s32.totalorder %s509_s9, %s509_s9 }
  0x3b   :  { %389 = vmatprep.subr.bf16.mxu0 %v542_v0  ;;  %v166_v20 = vld [vmem:[#allocation8 + $0x28] sm:$0xff]  ;;  %v396_v21 = vpack.c.bf16 %v73_v17, %v72_v16  ;;  %v74_v22 = vld [vmem:[#allocation6 + $0x40] sm:$0xff]  ;;  %v167_v25 = vld [vmem:[#allocation8 + $0x30] sm:$0xff] }
  0x3c   :  { %412 = vmatpush3.bf16.msra.mxu1 %v411_v15  ;;  %v75_v23 = vld [vmem:[#allocation6 + $0x48] sm:$0xff]  ;;  %v417_v24 = vpack.c.bf16 %v166_v20, %v165_v19  ;;  %v168_v26 = vld [vmem:[#allocation8 + $0x38] sm:$0xff]  ;;  %v76_v28 = vld [vmem:[#allocation6 + $0x50] sm:$0xff]  ;;  %p516_p13 = por %p515_p12, %p514_p11 }
  0x3d   :  { %413 = vmatprep.subr.bf16.mxu1 %v542_v0  ;;  %v399_v27 = vpack.c.bf16 %v75_v23, %v74_v22  ;;  %v77_v29 = vld [vmem:[#allocation6 + $0x58] sm:$0xff]  ;;  %v420_v30 = vpack.c.bf16 %v168_v26, %v167_v25  ;;  %v169_v31 = vld [vmem:[#allocation8 + $0x40] sm:$0xff]  ;;  %v170_v32 = vld [vmem:[#allocation8 + $0x48] sm:$0xff] }
  0x3e   :  { %391 = vmatpush3.bf16.msra.mxu0 %v390_v7  ;;  %v402_v33 = vpack.c.bf16 %v77_v29, %v76_v28  ;;  %v78_v34 = vld [vmem:[#allocation6 + $0x60] sm:$0xff]  ;;  %v79_v35 = vld [vmem:[#allocation6 + $0x68] sm:$0xff]  ;;  %v423_v36 = vpack.c.bf16 %v170_v32, %v169_v31  ;;  %v171_v37 = vld [vmem:[#allocation8 + $0x50] sm:$0xff]  ;;  %p517_p0 = pnand %p516_p13, %p510_p10 }
  0x3f   :  { %392 = vmatprep.subr.bf16.mxu0 %v542_v0  ;;  %v172_v38 = vld [vmem:[#allocation8 + $0x58] sm:$0xff]  ;;  %v405_v39 = vpack.c.bf16 %v79_v35, %v78_v34  ;;  %v80_v40 = vld [vmem:[#allocation6 + $0x70] sm:$0xff]  ;;  %v173_v43 = vld [vmem:[#allocation8 + $0x60] sm:$0xff] }
  0x40   :  { %415 = vmatpush3.bf16.msra.mxu1 %v414_v18  ;;  %v81_v41 = vld [vmem:[#allocation6 + $0x78] sm:$0xff]  ;;  %v426_v42 = vpack.c.bf16 %v172_v38, %v171_v37  ;;  %v174_v44 = vld [vmem:[#allocation8 + $0x68] sm:$0xff]  ;;  %v175_v48 = vld [vmem:[#allocation8 + $0x70] sm:$0xff] }
  0x41   :  { %416 = vmatprep.subr.bf16.mxu1 %v542_v0  ;;  %v408_v45 = vpack.c.bf16 %v81_v41, %v80_v40  ;;  %v429_v46 = vpack.c.bf16 %v174_v44, %v173_v43  ;;  %v65_v47 = vld [vmem:[#allocation3] sm:$0xff] }
  0x42   :  { %394 = vmatpush3.bf16.msra.mxu0 %v393_v14  ;;  %v176_v49 = vld [vmem:[#allocation8 + $0x78] sm:$0xff] }
  0x43   :  { %395 = vmatprep.subr.bf16.mxu0 %v542_v0  ;;  %v432_v50 = vpack.c.bf16 %v176_v49, %v175_v48  ;;  %v280_v51 = vld [vmem:[%s654_s2] ss:$0 sm:$0xff] }
  0x44   :  { %418 = vmatpush3.bf16.msra.mxu1 %v417_v24  ;;  %v281_v56 = vld [vmem:[%s656_s4] ss:$0 sm:$0xff] }
  0x45   :  { %419 = vmatprep.subr.bf16.mxu1 %v542_v0 }
  0x46   :  { %397 = vmatpush3.bf16.msra.mxu0 %v396_v21 }
  0x47   :  { %398 = vmatprep.subr.bf16.mxu0 %v542_v0 }
  0x48   :  { %421 = vmatpush3.bf16.msra.mxu1 %v420_v30 }
  0x49   :  { %422 = vmatprep.subr.bf16.mxu1 %v542_v0 }
  0x4a   :  { %400 = vmatpush3.bf16.msra.mxu0 %v399_v27 }
  0x4b   :  { %401 = vmatprep.subr.bf16.mxu0 %v542_v0 }
  0x4c   :  { %424 = vmatpush3.bf16.msra.mxu1 %v423_v36 }
  0x4d   :  { %425 = vmatprep.subr.bf16.mxu1 %v542_v0 }
  0x4e   :  { %403 = vmatpush3.bf16.msra.mxu0 %v402_v33 }
  0x4f   :  { %404 = vmatprep.subr.bf16.mxu0 %v542_v0 }
  0x50   :  { %427 = vmatpush3.bf16.msra.mxu1 %v426_v42 }
  0x51   :  { %428 = vmatprep.subr.bf16.mxu1 %v542_v0 }
  0x52   :  { %406 = vmatpush3.bf16.msra.mxu0 %v405_v39 }
  0x53   :  { %407 = vmatprep.subr.bf16.mxu0 %v542_v0 }
  0x54   :  { %430 = vmatpush3.bf16.msra.mxu1 %v429_v46 }
  0x55   :  { %431 = vmatprep.subr.bf16.mxu1 %v542_v0 }
  0x56   :  { %409 = vmatpush3.bf16.msra.mxu0 %v408_v45 }
  0x58   :  { %433 = vmatpush3.bf16.msra.mxu1 %v432_v50 }
  0x59   :  { %349 = vmatmul.mubr.f32.vlgmr.msra.gmra.mrb[0].mxu0 %v65_v47 }
 0x12c   :  { %v155_v52 = vpop.f32.mrb[0].mxu0 }
 0x12d   :  { %v156_v53 = vadd.f32 %v280_v51, %v155_v52  ;;  %v350_v54 = vpop.f32.mrb[1].mxu0 }
 0x12f   :  { %v159_v55 = vmax.f32 %v156_v53, 0.0 }
 0x131   :  { %384 = vmatmul.mubr.f32.vlgmr.msra.gmra.mrb[0].mxu1 %v159_v55 }
 0x204   :  { %v243_v57 = vpop.f32.mrb[0].mxu1 }
 0x205   :  { %v260_v58 = vadd.f32 %v281_v56, %v243_v57  ;;  %v385_v59 = vpop.f32.mrb[1].mxu1 }
 0x207   :  { %v261_v60 = vadd.f32 %v260_v58, %v65_v47 }
 0x209   :  { %v262_v61 = vmax.f32 %v261_v60, 0.0 }
 0x20b   :  { %263 = vst [vmem:[#allocation9] sm:$0xff] %v262_v61 }
 0x20c   :  { %520 = shalt.err (!%p517_p0)
}
 0x20d   :  { %s521_s4 = scalar_lea.hbm %s657_s5, 128 }
 0x20e   :  { %p522_p1 = scmp.ne.s32.totalorder %s657_s5, %s521_s4  ;;  %p525_p2 = scmp.lt.u32.totalorder %s521_s4, %s657_s5 }
 0x210   :  { %p527_p3 = pnand %p525_p2, %p522_p1 }
 0x212   :  { %530 = shalt.err (!%p527_p3)
}
 0x213   :  { %273 = dma.vmem_to_hbm [thread:$0]  %s271_s8, 128, %s657_s5, [#allocation5]  }
 0x214   :  { %535 = dma.done.wait [#allocation5], 128  }
 0x215   :  { %536 = vsyncadd [#allocation5], 4294967168 }
 0x216   :  { %277 = vsyncpa [#allocation4], 1 }
 0x217   :  { %278 = vsyncpa [#allocation7], 1 }
 0x218   :  { %279 = vsyncpa [#allocation5], 1 }

</bundles_post_ra>
